<compile_context>
chip_gen: v5e
topology: v5e:2x2
jax: 0.10.0
libtpu: 0.0.40
codegen_flags: <defaults>
</compile_context>

<pallas_src>
import jax
import jax.numpy as jnp
from jax.experimental import pallas as pl
from jax.experimental.pallas import tpu as pltpu


_SQRT_HALF = 0.7071067811865476


def _erf_approx(x):
    """erf via Abramowitz & Stegun 7.1.26 (|error| <= 1.5e-7).

    Built only from elementwise ops with guaranteed Mosaic lowerings.
    Kept exact (no approx reciprocal) so the 1e-4 tolerance is safe; the GELU
    is free filler once the MXU dominates at production hidden sizes.
    """
    a1, a2, a3, a4, a5 = (0.254829592, -0.284496736, 1.421413741,
                          -1.453152027, 1.061405429)
    p = 0.3275911
    ax = jnp.abs(x)
    t = 1.0 / (1.0 + p * ax)
    poly = ((((a5 * t + a4) * t + a3) * t + a2) * t + a1) * t
    y = 1.0 - poly * jnp.exp(-(ax * ax))
    return jnp.where(x < 0, -y, y)


def _gelu_exact(x):
    # Matches torch.nn.GELU() default (erf form).
    return 0.5 * x * (1.0 + _erf_approx(x * _SQRT_HALF))


def _expert_ffn_kernel(x_ref, w1_ref, b1_ref, w2_ref, b2_ref, o_ref, acc_ref):
    # x_ref : (1, 1, tC, H_pad)   token tile for (expert e, batch b, tile t)
    # w1_ref: (1, H_pad, tF)      b1_ref: (1, 1, tF)
    # w2_ref: (1, tF, H_pad)      b2_ref: (1, 1, H_pad)
    # acc_ref: (tC, H_pad) f32 scratch accumulator over the F (innermost) axis.
    f = pl.program_id(3)
    n_f = pl.num_programs(3)

    @pl.when(f == 0)
    def _():
        # Seed the accumulator with the second bias.
        acc_ref[...] = jnp.broadcast_to(
            b2_ref[0].astype(jnp.float32), acc_ref.shape)

    x = x_ref[0, 0]                      # (tC, H_pad)
    w1 = w1_ref[0]                       # (H_pad, tF)
    w2 = w2_ref[0]                       # (tF, H_pad)

    # First matmul + bias: f32 accumulation on the MXU.
    h = jnp.dot(x, w1, preferred_element_type=jnp.float32) + b1_ref[0]
    h = _gelu_exact(h)
    # Cast back to the weight dtype so bf16 deployments keep the MXU bf16-fed.
    h = h.astype(w2.dtype)
    acc_ref[...] += jnp.dot(h, w2, preferred_element_type=jnp.float32)

    @pl.when(f == n_f - 1)
    def _():
        o_ref[0, 0] = acc_ref[...].astype(o_ref.dtype)


def _round_up(x, m):
    return (x + m - 1) // m * m


def _sublane_multiple(dtype):
    # f32 -> 8, bf16 -> 16, int8/fp8 -> 32 (sublane packing).
    return max(8, 32 // jnp.dtype(dtype).itemsize)


def _vmem_budget_bytes():
    # Generation-aware budget: ~51 MiB on v7x (64 MiB VMEM), ~102 MiB on
    # v5e/v6e (128 MiB), leaving 20% headroom for Mosaic internal scratch.
    try:
        cap = pltpu.get_tpu_info().vmem_capacity_bytes
    except Exception:
        cap = 128 * 1024 * 1024
    return int(cap * 0.80)


def _tile_footprint_bytes(t_c, t_f, h_pad, x_bytes, w_bytes):
    return (2 * t_c * h_pad * x_bytes          # input tile, double-buffered
            + 2 * t_c * h_pad * x_bytes        # output tile, double-buffered
            + 2 * h_pad * t_f * w_bytes        # w1 tile, double-buffered
            + 2 * t_f * h_pad * w_bytes        # w2 tile, double-buffered
            + 2 * 8 * t_f * w_bytes            # b1 (sublane-padded)
            + 2 * 8 * h_pad * w_bytes          # b2 (sublane-padded)
            + t_c * h_pad * 4                  # f32 accumulator scratch
            + 3 * t_c * t_f * 4)               # f32 h + GELU temps + cast copy


def _pick_tiles(c_pad, f_pad, h_pad, x_bytes, w_bytes, budget, sub):
    # Largest (tC, tF) whose pipelined footprint fits the per-generation budget.
    tc_cands = sorted(
        {t for t in range(sub, min(c_pad, 1024) + 1, sub) if c_pad % t == 0},
        reverse=True)
    tf_cands = sorted(
        {t for t in range(128, min(f_pad, 4096) + 1, 128) if f_pad % t == 0},
        reverse=True)
    for t_c in tc_cands:
        for t_f in tf_cands:
            if _tile_footprint_bytes(t_c, t_f, h_pad, x_bytes, w_bytes) <= budget:
                return t_c, t_f
    return tc_cands[-1], tf_cands[-1]


def experts_forward(inputs, w1, b1, w2, b2, num_local_experts):
    """inputs: (B, E*C, H).  Per-expert params:
       w1: (E, H, F), b1: (E, F), w2: (E, F, H), b2: (E, H).
       Returns (B, E*C, H) -- identical layout to the PyTorch module."""
    B, S, H = inputs.shape
    E = num_local_experts
    assert S % E == 0, "sequence dim must split evenly across local experts"
    C = S // E
    F = w1.shape[-1]

    x_bytes = jnp.dtype(inputs.dtype).itemsize
    w_bytes = jnp.dtype(w1.dtype).itemsize

    sub = _sublane_multiple(inputs.dtype)
    H_pad = _round_up(H, 128)     # lane-dense output slab / full MXU N-dim
    F_pad = _round_up(F, 128)
    C_pad = _round_up(C, sub)     # sublane-aligned token tiles

    budget = _vmem_budget_bytes()
    tC, tF = _pick_tiles(C_pad, F_pad, H_pad, x_bytes, w_bytes, budget, sub)
    nT = C_pad // tC
    nF = F_pad // tF

    # Zero-padding is exact for this FFN: padded x/w1 rows contribute 0 to the
    # first matmul, GELU(0 + 0) = 0, and padded w2 rows / b2 lanes are zero,
    # so padded output lanes are 0 and padded token rows are sliced off below.
    x4 = inputs.reshape(B, E, C, H)
    if C_pad != C or H_pad != H:
        x4 = jnp.pad(x4, ((0, 0), (0, 0), (0, C_pad - C), (0, H_pad - H)))
    if H_pad != H or F_pad != F:
        w1_p = jnp.pad(w1, ((0, 0), (0, H_pad - H), (0, F_pad - F)))
        w2_p = jnp.pad(w2, ((0, 0), (0, F_pad - F), (0, H_pad - H)))
    else:
        w1_p, w2_p = w1, w2
    b1_p = (jnp.pad(b1, ((0, 0), (0, F_pad - F))) if F_pad != F else b1)
    b2_p = (jnp.pad(b2, ((0, 0), (0, H_pad - H))) if H_pad != H else b2)
    b1_r = b1_p.reshape(E, 1, F_pad)
    b2_r = b2_p.reshape(E, 1, H_pad)

    cost = pl.CostEstimate(
        flops=2 * B * E * C * (H * F + F * H),
        transcendentals=B * E * C * F,            # one exp per GELU element
        bytes_accessed=(2 * inputs.size * x_bytes
                        + B * nT * (w1.size + w2.size) * w_bytes
                        + (b1.size + b2.size) * w_bytes),
    )

    grid = (E, B, nT, nF)

    out4 = pl.pallas_call(
        _expert_ffn_kernel,
        out_shape=jax.ShapeDtypeStruct((B, E, C_pad, H_pad), inputs.dtype),
        grid_spec=pltpu.PrefetchScalarGridSpec(
            num_scalar_prefetch=0,
            grid=grid,
            in_specs=[
                # chunk(dim=1): inputs viewed as (B, E, C_pad, H_pad); expert e,
                # batch row b, token tile t.
                pl.BlockSpec((1, 1, tC, H_pad), lambda e, b, t, f: (b, e, t, 0)),
                # Weight tiles stream along the innermost F axis; their block
                # index is independent of (b, t) so they stay resident over the
                # innermost revisit and never duplicate across v7x cores
                # (megacore split is restricted to the E/B axes).
                # TODO(synk): if profiling shows exposed DMA on the activation
                # stream at small tC, set pipeline_mode=pl.Buffered(3) on the
                # x/out specs only (never deepen weight buffering).
                pl.BlockSpec((1, H_pad, tF), lambda e, b, t, f: (e, 0, f)),
                pl.BlockSpec((1, 1, tF), lambda e, b, t, f: (e, 0, f)),
                pl.BlockSpec((1, tF, H_pad), lambda e, b, t, f: (e, f, 0)),
                pl.BlockSpec((1, 1, H_pad), lambda e, b, t, f: (e, 0, 0)),
            ],
            out_specs=pl.BlockSpec((1, 1, tC, H_pad),
                                   lambda e, b, t, f: (b, e, t, 0)),
            scratch_shapes=[pltpu.VMEM((tC, H_pad), jnp.float32)],
        ),
        compiler_params=pltpu.CompilerParams(
            dimension_semantics=("parallel", "parallel", "arbitrary", "arbitrary"),
            vmem_limit_bytes=budget,
        ),
        cost_estimate=cost,
    )(x4, w1_p, b1_r, w2_p, b2_r)

    # Slice off the lane/sublane padding and restore the (B, E*C, H) layout.
    out = out4[:, :, :C, :H].reshape(B, S, H)
    return out


def _reference_forward(inputs, w1, b1, w2, b2, num_local_experts):
    """Plain-JAX mirror of the PyTorch Experts.forward (exact erf GELU)."""
    E = num_local_experts
    chunks = jnp.split(inputs, E, axis=1)
    outs = []
    for e, chunk in enumerate(chunks):
        h = jax.nn.gelu(chunk @ w1[e] + b1[e], approximate=False)
        outs.append(h @ w2[e] + b2[e])
    return jnp.concatenate(outs, axis=1)


if __name__ == "__main__":
    # Small deterministic problem: batch=2, experts=2, capacity=8, hidden=32, ffn=64
    B, E, C, H, F = 2, 2, 8, 32, 64
    key = jax.random.PRNGKey(0)
    k_x, k_w1, k_b1, k_w2, k_b2 = jax.random.split(key, 5)

    inputs = jax.random.normal(k_x, (B, E * C, H), dtype=jnp.float32)

    # torch's Experts deep-copies one expert -> identical initial weights per expert.
    w1_single = jax.random.normal(k_w1, (H, F), dtype=jnp.float32) * (1.0 / jnp.sqrt(H))
    b1_single = jax.random.normal(k_b1, (F,), dtype=jnp.float32) * 0.01
    w2_single = jax.random.normal(k_w2, (F, H), dtype=jnp.float32) * (1.0 / jnp.sqrt(F))
    b2_single = jax.random.normal(k_b2, (H,), dtype=jnp.float32) * 0.01

    w1 = jnp.tile(w1_single[None], (E, 1, 1))
    b1 = jnp.tile(b1_single[None], (E, 1))
    w2 = jnp.tile(w2_single[None], (E, 1, 1))
    b2 = jnp.tile(b2_single[None], (E, 1))

    out = experts_forward(inputs, w1, b1, w2, b2, num_local_experts=E)
    out = jax.block_until_ready(out)

    ref = _reference_forward(inputs, w1, b1, w2, b2, num_local_experts=E)
    assert out.shape == (B, E * C, H)
    assert jnp.allclose(out, ref, atol=1e-4, rtol=1e-4), "Pallas output mismatch vs reference"

    print("KERNEL_OK")
</pallas_src>

<mosaic_0001>
module attributes {stable_mosaic.version = 11 : i64} {
  func.func @_expert_ffn_kernel(%arg0: i32, %arg1: i32, %arg2: i32, %arg3: i32, %arg4: memref<1x1x8x128xf32, #tpu.memory_space<vmem>>, %arg5: memref<1x128x128xf32, #tpu.memory_space<vmem>>, %arg6: memref<1x1x128xf32, #tpu.memory_space<vmem>>, %arg7: memref<1x128x128xf32, #tpu.memory_space<vmem>>, %arg8: memref<1x1x128xf32, #tpu.memory_space<vmem>>, %arg9: memref<1x1x8x128xf32, #tpu.memory_space<vmem>>, %arg10: memref<8x128xf32, #tpu.memory_space<vmem>>) attributes {dimension_semantics = [#tpu.dimension_semantics<parallel>, #tpu.dimension_semantics<parallel>, #tpu.dimension_semantics<arbitrary>, #tpu.dimension_semantics<arbitrary>], iteration_bounds = array<i64: 2, 2, 1, 1>, scalar_prefetch = 0 : i64, scratch_operands = 1 : i64, tpu.core_type = #tpu.core_type<tc>, window_params = [{transform_indices = @transform_0, window_bounds = array<i64: 1, 1, 8, 128>}, {transform_indices = @transform_1, window_bounds = array<i64: 1, 128, 128>}, {transform_indices = @transform_2, window_bounds = array<i64: 1, 1, 128>}, {transform_indices = @transform_3, window_bounds = array<i64: 1, 128, 128>}, {transform_indices = @transform_4, window_bounds = array<i64: 1, 1, 128>}, {transform_indices = @transform_5, window_bounds = array<i64: 1, 1, 8, 128>}]} {
    %c0_i32 = arith.constant 0 : i32
    %0 = arith.cmpi eq, %arg3, %c0_i32 : i32
    %1 = arith.extui %0 : i1 to i32
    %c0_i32_0 = arith.constant 0 : i32
    %2 = arith.cmpi ne, %1, %c0_i32_0 : i32
    scf.if %2 {
      %c0_35 = arith.constant 0 : index
      %c0_36 = arith.constant 0 : index
      %c0_37 = arith.constant 0 : index
      %61 = vector.load %arg8[%c0_35, %c0_36, %c0_37] : memref<1x1x128xf32, #tpu.memory_space<vmem>>, vector<1x1x128xf32>
      %62 = vector.shape_cast %61 : vector<1x1x128xf32> to vector<1x128xf32>
      %63 = vector.shape_cast %62 : vector<1x128xf32> to vector<1x128xf32>
      %64 = vector.broadcast %63 : vector<1x128xf32> to vector<8x128xf32>
      %c0_38 = arith.constant 0 : index
      %c0_39 = arith.constant 0 : index
      %65 = vector.load %arg10[%c0_38, %c0_39] : memref<8x128xf32, #tpu.memory_space<vmem>>, vector<8x128xf32>
      tpu.vector_store %arg10[%c0_38, %c0_39], %64 {strides = array<i32>} : memref<8x128xf32, #tpu.memory_space<vmem>>, vector<8x128xf32>,
    } else {
    }
    %c0 = arith.constant 0 : index
    %c0_1 = arith.constant 0 : index
    %c0_2 = arith.constant 0 : index
    %c0_3 = arith.constant 0 : index
    %3 = vector.load %arg4[%c0, %c0_1, %c0_2, %c0_3] : memref<1x1x8x128xf32, #tpu.memory_space<vmem>>, vector<1x1x8x128xf32>
    %4 = vector.shape_cast %3 : vector<1x1x8x128xf32> to vector<8x128xf32>
    %c0_4 = arith.constant 0 : index
    %c0_5 = arith.constant 0 : index
    %c0_6 = arith.constant 0 : index
    %5 = vector.load %arg5[%c0_4, %c0_5, %c0_6] : memref<1x128x128xf32, #tpu.memory_space<vmem>>, vector<1x128x128xf32>
    %6 = vector.shape_cast %5 : vector<1x128x128xf32> to vector<128x128xf32>
    %c0_7 = arith.constant 0 : index
    %c0_8 = arith.constant 0 : index
    %c0_9 = arith.constant 0 : index
    %7 = vector.load %arg7[%c0_7, %c0_8, %c0_9] : memref<1x128x128xf32, #tpu.memory_space<vmem>>, vector<1x128x128xf32>
    %8 = vector.shape_cast %7 : vector<1x128x128xf32> to vector<128x128xf32>
    %cst = arith.constant dense<0.000000e+00> : vector<8x128xf32>
    %9 = tpu.matmul %4, %6, %cst {dimension_numbers = #tpu.dot_dimension_numbers<[1], [0], [0], [1], [0, 0, 1, 1], [], []>} : vector<8x128xf32>, vector<128x128xf32>, vector<8x128xf32> -> vector<8x128xf32>
    %c0_10 = arith.constant 0 : index
    %c0_11 = arith.constant 0 : index
    %c0_12 = arith.constant 0 : index
    %10 = vector.load %arg6[%c0_10, %c0_11, %c0_12] : memref<1x1x128xf32, #tpu.memory_space<vmem>>, vector<1x1x128xf32>
    %11 = vector.shape_cast %10 : vector<1x1x128xf32> to vector<1x128xf32>
    %12 = vector.broadcast %11 : vector<1x128xf32> to vector<8x128xf32>
    %13 = arith.addf %9, %12 : vector<8x128xf32>
    %cst_13 = arith.constant 5.000000e-01 : f32
    %14 = vector.broadcast %cst_13 : f32 to vector<8x128xf32>
    %15 = arith.mulf %14, %13 : vector<8x128xf32>
    %cst_14 = arith.constant 0.707106769 : f32
    %16 = vector.broadcast %cst_14 : f32 to vector<8x128xf32>
    %17 = arith.mulf %13, %16 : vector<8x128xf32>
    %18 = math.absf %17 : vector<8x128xf32>
    %cst_15 = arith.constant 0.327591091 : f32
    %19 = vector.broadcast %cst_15 : f32 to vector<8x128xf32>
    %20 = arith.mulf %19, %18 : vector<8x128xf32>
    %cst_16 = arith.constant 1.000000e+00 : f32
    %21 = vector.broadcast %cst_16 : f32 to vector<8x128xf32>
    %22 = arith.addf %21, %20 : vector<8x128xf32>
    %cst_17 = arith.constant 1.000000e+00 : f32
    %23 = vector.broadcast %cst_17 : f32 to vector<8x128xf32>
    %24 = arith.divf %23, %22 : vector<8x128xf32>
    %cst_18 = arith.constant 1.06140542 : f32
    %25 = vector.broadcast %cst_18 : f32 to vector<8x128xf32>
    %26 = arith.mulf %25, %24 : vector<8x128xf32>
    %cst_19 = arith.constant -1.45315206 : f32
    %27 = vector.broadcast %cst_19 : f32 to vector<8x128xf32>
    %28 = arith.addf %26, %27 : vector<8x128xf32>
    %29 = arith.mulf %28, %24 : vector<8x128xf32>
    %cst_20 = arith.constant 1.42141378 : f32
    %30 = vector.broadcast %cst_20 : f32 to vector<8x128xf32>
    %31 = arith.addf %29, %30 : vector<8x128xf32>
    %32 = arith.mulf %31, %24 : vector<8x128xf32>
    %cst_21 = arith.constant -0.284496725 : f32
    %33 = vector.broadcast %cst_21 : f32 to vector<8x128xf32>
    %34 = arith.addf %32, %33 : vector<8x128xf32>
    %35 = arith.mulf %34, %24 : vector<8x128xf32>
    %cst_22 = arith.constant 0.254829586 : f32
    %36 = vector.broadcast %cst_22 : f32 to vector<8x128xf32>
    %37 = arith.addf %35, %36 : vector<8x128xf32>
    %38 = arith.mulf %37, %24 : vector<8x128xf32>
    %39 = arith.mulf %18, %18 : vector<8x128xf32>
    %cst_23 = arith.constant 0.000000e+00 : f32
    %40 = vector.broadcast %cst_23 : f32 to vector<8x128xf32>
    %41 = arith.subf %40, %39 : vector<8x128xf32>
    %42 = math.exp %41 : vector<8x128xf32>
    %43 = arith.mulf %38, %42 : vector<8x128xf32>
    %cst_24 = arith.constant 1.000000e+00 : f32
    %44 = vector.broadcast %cst_24 : f32 to vector<8x128xf32>
    %45 = arith.subf %44, %43 : vector<8x128xf32>
    %cst_25 = arith.constant 0.000000e+00 : f32
    %46 = vector.broadcast %cst_25 : f32 to vector<8x128xf32>
    %47 = arith.cmpf olt, %17, %46 : vector<8x128xf32>
    %cst_26 = arith.constant 0.000000e+00 : f32
    %48 = vector.broadcast %cst_26 : f32 to vector<8x128xf32>
    %49 = arith.subf %48, %45 : vector<8x128xf32>
    %50 = arith.select %47, %49, %45 : vector<8x128xi1>, vector<8x128xf32>
    %cst_27 = arith.constant 1.000000e+00 : f32
    %51 = vector.broadcast %cst_27 : f32 to vector<8x128xf32>
    %52 = arith.addf %51, %50 : vector<8x128xf32>
    %53 = arith.mulf %15, %52 : vector<8x128xf32>
    %c0_28 = arith.constant 0 : index
    %c0_29 = arith.constant 0 : index
    %54 = vector.load %arg10[%c0_28, %c0_29] : memref<8x128xf32, #tpu.memory_space<vmem>>, vector<8x128xf32>
    %cst_30 = arith.constant dense<0.000000e+00> : vector<8x128xf32>
    %55 = tpu.matmul %53, %8, %cst_30 {dimension_numbers = #tpu.dot_dimension_numbers<[1], [0], [0], [1], [0, 0, 1, 1], [], []>} : vector<8x128xf32>, vector<128x128xf32>, vector<8x128xf32> -> vector<8x128xf32>
    %56 = arith.addf %54, %55 : vector<8x128xf32>
    %c0_31 = arith.constant 0 : index
    %c0_32 = arith.constant 0 : index
    %57 = vector.load %arg10[%c0_31, %c0_32] : memref<8x128xf32, #tpu.memory_space<vmem>>, vector<8x128xf32>
    tpu.vector_store %arg10[%c0_31, %c0_32], %56 {strides = array<i32>} : memref<8x128xf32, #tpu.memory_space<vmem>>, vector<8x128xf32>,
    %c0_i32_33 = arith.constant 0 : i32
    %58 = arith.cmpi eq, %arg3, %c0_i32_33 : i32
    %59 = arith.extui %58 : i1 to i32
    %c0_i32_34 = arith.constant 0 : i32
    %60 = arith.cmpi ne, %59, %c0_i32_34 : i32
    scf.if %60 {
      %c0_35 = arith.constant 0 : index
      %c0_36 = arith.constant 0 : index
      %61 = vector.load %arg10[%c0_35, %c0_36] : memref<8x128xf32, #tpu.memory_space<vmem>>, vector<8x128xf32>
      %c0_37 = arith.constant 0 : index
      %c0_38 = arith.constant 0 : index
      %c0_39 = arith.constant 0 : index
      %c0_40 = arith.constant 0 : index
      %62 = vector.load %arg9[%c0_37, %c0_38, %c0_39, %c0_40] : memref<1x1x8x128xf32, #tpu.memory_space<vmem>>, vector<1x1x8x128xf32>
      %63 = vector.shape_cast %62 : vector<1x1x8x128xf32> to vector<8x128xf32>
      %64 = vector.shape_cast %61 : vector<8x128xf32> to vector<1x1x8x128xf32>
      tpu.vector_store %arg9[%c0_37, %c0_38, %c0_39, %c0_40], %64 {strides = array<i32>} : memref<1x1x8x128xf32, #tpu.memory_space<vmem>>, vector<1x1x8x128xf32>,
    } else {
    }
    return
  }
  func.func @transform_0(%arg0: i32, %arg1: i32, %arg2: i32, %arg3: i32) -> (i32, i32, i32, i32) {
    %c0_i32 = arith.constant 0 : i32
    %c0_i32_0 = arith.constant 0 : i32
    return %arg1, %arg0, %arg2, %c0_i32 : i32, i32, i32, i32
  }
  func.func @transform_1(%arg0: i32, %arg1: i32, %arg2: i32, %arg3: i32) -> (i32, i32, i32) {
    %c0_i32 = arith.constant 0 : i32
    %c0_i32_0 = arith.constant 0 : i32
    return %arg0, %c0_i32, %arg3 : i32, i32, i32
  }
  func.func @transform_2(%arg0: i32, %arg1: i32, %arg2: i32, %arg3: i32) -> (i32, i32, i32) {
    %c0_i32 = arith.constant 0 : i32
    %c0_i32_0 = arith.constant 0 : i32
    return %arg0, %c0_i32, %arg3 : i32, i32, i32
  }
  func.func @transform_3(%arg0: i32, %arg1: i32, %arg2: i32, %arg3: i32) -> (i32, i32, i32) {
    %c0_i32 = arith.constant 0 : i32
    %c0_i32_0 = arith.constant 0 : i32
    return %arg0, %arg3, %c0_i32 : i32, i32, i32
  }
  func.func @transform_4(%arg0: i32, %arg1: i32, %arg2: i32, %arg3: i32) -> (i32, i32, i32) {
    %c0_i32 = arith.constant 0 : i32
    %c0_i32_0 = arith.constant 0 : i32
    %c0_i32_1 = arith.constant 0 : i32
    return %arg0, %c0_i32, %c0_i32_0 : i32, i32, i32
  }
  func.func @transform_5(%arg0: i32, %arg1: i32, %arg2: i32, %arg3: i32) -> (i32, i32, i32, i32) {
    %c0_i32 = arith.constant 0 : i32
    %c0_i32_0 = arith.constant 0 : i32
    return %arg1, %arg0, %arg2, %c0_i32 : i32, i32, i32, i32
  }
}

</mosaic_0001>

<bundles_post_ra>
// kernel: tpu_custom_call.1
= control target key start
LH: loop header
LB: loop body
LE: loop exit
PB: predicated region body
PF: predicated region fallthrough
CT: control target
= control target key end

     0   :  { %s1504_s0 = inlined_call_operand.hbm [shape: f32[2,2,8,128], index: 0, kind: input, shape index: {}]   ;;  %s1505_s1 = inlined_call_operand.hbm [shape: f32[2,128,128], index: 1, kind: input, shape index: {}]   ;;  %s1506_s2 = inlined_call_operand.hbm [shape: f32[2,1,128], index: 2, kind: input, shape index: {}]   ;;  %s1507_s3 = inlined_call_operand.hbm [shape: f32[2,128,128], index: 3, kind: input, shape index: {}]   ;;  %s1508_s4 = inlined_call_operand.vmem [shape: f32[2,1,128], index: 4, kind: input, shape index: {}]   ;;  %s1509_s5 = inlined_call_operand.hbm [shape: f32[2,2,8,128], index: 5, kind: output, shape index: {}]  }
   0x1   :  { %1524 = sst [smem:[#allocation26_spill]] %s1504_s0 }
   0x2   :  { %1525 = sst [smem:[#allocation27_spill]] %s1505_s1 }
   0x3   :  { %1526 = sst [smem:[#allocation28_spill]] %s1508_s4 }
   0x4   :  { %1527 = sst [smem:[#allocation29_spill]] %s1509_s5 }
   0x5   :  { %10 = vsyncpa [#allocation4], 0 }
   0x6   :  { %12 = vsyncpa [#allocation4 + $0x1], 0 }
   0x7   :  { %13 = vsyncpa [#allocation7], 0 }
   0x8   :  { %15 = vsyncpa [#allocation7 + $0x1], 0 }
   0x9   :  { %16 = vsyncpa [#allocation10], 0 }
   0xa   :  { %18 = vsyncpa [#allocation10 + $0x1], 0 }
   0xb   :  { %19 = vsyncpa [#allocation5], 0 }
   0xc   :  { %21 = vsyncpa [#allocation5 + $0x1], 0  ;;  %s1177_s18 = smov 0   ;;  %s1179_s19 = smov 0  }
   0xd   :  { %s1181_s20 = smov 0   ;;  %s1183_s21 = smov 0  }
   0xe   :  { %s1185_s22 = smov 0   ;;  %s1187_s23 = smov 0  }
   0xf   :  { %s1189_s24 = smov 0   ;;  %s1191_s25 = smov 0  }
  0x10   :  { %s1193_s26 = smov 0   ;;  %s1195_s27 = smov 0  }
  0x11   :  { %s1197_s28 = smov 0  }
  0x12 LB: > { %1528 = sst [smem:[#allocation16_spill]] %s1111_s20  ;;  %p72_p0 = scmp.eq.s32.totalorder %s1143_s28, 0  ;;  %s1143_s28 = sphi %s1197_s28, %s27_s28   ;;  %s1139_s27 = sphi %s1195_s27, %s1572_s27   ;;  %s1135_s26 = sphi %s1193_s26, %s1571_s26   ;;  %s1131_s25 = sphi %s1191_s25, %s1570_s25   ;;  %s1127_s24 = sphi %s1189_s24, %s1563_s24   ;;  %s1123_s23 = sphi %s1187_s23, %s1562_s23   ;;  %s1119_s22 = sphi %s1185_s22, %s1569_s22   ;;  %s1115_s21 = sphi %s1183_s21, %s1568_s21   ;;  %s1111_s20 = sphi %s1181_s20, %s1560_s20   ;;  %s1107_s19 = sphi %s1179_s19, %s1567_s19   ;;  %s1103_s18 = sphi %s1177_s18, %s1566_s18  }
  0x13   : > { %1529 = sst [smem:[#allocation17_spill]] %s1115_s21  ;;  %p99_p1 = scmp.ne.s32.totalorder %s1111_s20, %s1107_s19 }
  0x14   : > { %1530 = sst [smem:[#allocation18_spill]] %s1123_s23  ;;  %p1517_p2 = scmp.lt.s32.totalorder %s1143_s28, 4 }
  0x15   : > { %1531 = sst [smem:[#allocation19_spill]] %s1127_s24  ;;  %p101_p3 = por %p99_p1, %p72_p0 }
  0x16   : > { %1532 = sst [smem:[#allocation20_spill]] %s1135_s26  ;;  %s263_s29 = sand.u32 1, %s1143_s28  }
  0x17   : > { %s1240_s30 = sand.u32 1, %s1111_s20   ;;  %s1513_s7 = sshll.u32 %s1139_s27, 7 }
  0x18   : > { %s1510_s6 = sshll.u32 %s1240_s30, 7  ;;  %s1533_s1 = sld [smem:[#allocation27_spill]] }
  0x19   : > { %s267_s12 = scalar_lea.vmem [#allocation6], %s1510_s6  ;;  %p1253_p4 = pnand %p1517_p2, %p101_p3 }
  0x1a   : > { %s276_s13 = sshll.u32 %s267_s12, 4  ;;  %p756_p5 = scmp.ge.s32.totalorder %s1143_s28, 1  ;;  %s277_s13 = int_to_ptr.vmem [resolvable:$true] %s276_s13 }
  0x1b   : > { %p332_p6 = scmp.lt.s32.totalorder %s1143_s28, 5  ;;  %s1259_s15 = scalar_lea.sflag [#allocation7], %s263_s29 }
  0x1c   : > { %s1511_s16 = smov 128   ;;  %s1512_s17 = smov 8  }
  0x1d   : > { %p1267_p7 = pnand %p756_p5, %p332_p6  ;;  %s1272_s9 = sadd.s32 4294967295, %s1143_s28  }
  0x1e   : > { %s273_s10 = scalar_lea.hbm %s1533_s1, %s1513_s7  ;;  %s744_s29 = sadd.s32 4294967294, %s1143_s28  }
  0x1f   : > { %s274_s11 = sshll.u32 %s273_s10, 4  ;;  %s49_s10 = sadd.s32 1, %s1135_s26  ;;  %s275_s11 = int_to_ptr.hbm [resolvable:$true] %s274_s11 }
  0x20   : > { %784 = dma.hbm_to_vmem [thread:$0]  (!%p1253_p4), %s275_s11, 2048, %s277_s13, %s1259_s15, %s1511_s16, %s1511_s16, %s1512_s17  }
  0x21   : > { %p51_p8 = scmp.ge.s32.totalorder %s49_s10, 2  ;;  %s53_s12 = sadd.s32 1, %s1139_s27 }
  0x22   : > { %s64_s6 = sadd.s32 1, %s1123_s23  ;;  %p71_p9 = scmp.ne.s32.totalorder %s1123_s23, %s1119_s22 }
  0x23   : > { %s1574_s10 = smov (%p51_p8, %s49_s10), 0  ;;  %s1576_s12 = smov (!%p51_p8, %s53_s12), %s1139_s27 }
  0x24   : > { %1536 = sst [smem:[#allocation21_spill]] %s1574_s10  ;;  %s57_s11 = ssub.s32 %s1135_s26, %s1574_s10 }
  0x25   : > { %p1290_p10 = por %p72_p0, %p71_p9  ;;  %p55_p11 = scmp.ge.s32.totalorder %s1576_s12, 2 }
  0x26   : > { %p77_p12 = scmp.ne.s32.totalorder %s1119_s22, %s1115_s21  ;;  %p78_p13 = scmp.eq.s32.totalorder %s1272_s9, 0 }
  0x27   : > { %s92_s16 = sadd.s32 1, %s1111_s20  ;;  %s1578_s12 = smov (%p55_p11, %s1576_s12), 0 }
  0x28   : > { %1538 = sst [smem:[#allocation22_spill]] %s1578_s12  ;;  %p1303_p1 = por %p78_p13, %p77_p12 }
  0x29   : > { %p105_p0 = scmp.ne.s32.totalorder %s1107_s19, %s1103_s18  ;;  %s58_s7 = ssub.s32 %s1139_s27, %s1578_s12 }
  0x2a   : > { %p215_p3 = scmp.eq.s32.totalorder %s1272_s9, 3  ;;  %s59_s1 = sor.u32 %s58_s7, %s57_s11 }
  0x2b   : > { %p90_p5 = scmp.eq.s32.totalorder %s58_s7, 0  ;;  %p62_p6 = scmp.eq.s32.totalorder %s59_s1, 0 }
  0x2c   : > { %p1312_p8 = por %p105_p0, %p78_p13  ;;  %p1325_p11 = por %p215_p3, %p71_p9 }
  0x2d   : > { %s1317_s5 = scalar_select %p90_p5, %s1111_s20, %s92_s16  }
  0x2e   : > { %s1320_s24 = scalar_select %p62_p6, %s1123_s23, %s64_s6  }
  0x2f   : > { %1541 = sst [smem:[#allocation23_spill]] %s1317_s5  ;;  %p221_p2 = scmp.eq.s32.totalorder %s744_s29, 3 }
  0x30   : > { %1542 = sst [smem:[#allocation24_spill]] %s1320_s24  ;;  %s241_s18 = sand.u32 1, %s1123_s23  }
  0x31   : > { %s748_s7 = sshll.u32 %s1135_s26, 1  ;;  %p1334_p13 = por %p221_p2, %p77_p12 }
  0x32   : > { %s747_s16 = sshll.u32 %s241_s18, 3  ;;  %s250_s11 = sadd.s32 %s1139_s27, %s748_s7 }
  0x33   : > { %s1544_s1 = scalar_select %p1334_p13, 1, 0 }
  0x34   : > { %s749_s12 = sshll.u32 %s250_s11, 3  ;;  %s1546_s0 = sld [smem:[#allocation26_spill]] }
  0x35   : > { %1545 = sst [smem:[#allocation25_spill]] %s1544_s1  ;;  %s245_s20 = scalar_lea.vmem [#allocation3], %s747_s16 }
  0x36   : > { %s256_s29 = sshll.u32 %s245_s20, 4  ;;  %p1547_p2 = scmp.lt.s32.totalorder %s1143_s28, 4  ;;  %s257_s29 = int_to_ptr.vmem [resolvable:$true] %s256_s29 }
  0x37   : > { %s293_s7 = scalar_lea.hbm %s1506_s2, %s1139_s27  ;;  %s242_s11 = scalar_lea.sflag [#allocation4], %s241_s18 }
  0x38   : > { %p779_p9 = pnand %p1547_p2, %p1290_p10  ;;  %s295_s24 = sshll.u32 %s293_s7, 4  ;;  %s296_s24 = int_to_ptr.hbm [resolvable:$true] %s295_s24 }
  0x39   : > { %s1549_s21 = sshll.u32 %s1240_s30, 7  ;;  %s305_s7 = scalar_lea.sflag [#allocation10], %s1240_s30 }
  0x3a   : > { %s252_s5 = scalar_lea.hbm %s1546_s0, %s749_s12  ;;  %s289_s12 = scalar_lea.vmem [#allocation8], %s1240_s30 }
  0x3b   : > { %s254_s26 = sshll.u32 %s252_s5, 4  ;;  %s297_s16 = sshll.u32 %s289_s12, 4  ;;  %s255_s26 = int_to_ptr.hbm [resolvable:$true] %s254_s26  ;;  %s298_s16 = int_to_ptr.vmem [resolvable:$true] %s297_s16 }
  0x3c   : > { %781 = dma.hbm_to_vmem [thread:$0]  (!%p779_p9), %s255_s26, 128, %s257_s29, %s242_s11  }
  0x3d   : > { %787 = dma.hbm_to_vmem [thread:$0]  (!%p1253_p4), %s296_s24, 16, %s298_s16, %s1259_s15  }
  0x3e   : > { %s1548_s5 = sshll.u32 %s1139_s27, 7  ;;  %s308_s23 = scalar_lea.vmem [#allocation9], %s1549_s21 }
  0x3f   : > { %s315_s6 = scalar_lea.hbm %s1507_s3, %s1548_s5  ;;  %s318_s1 = sshll.u32 %s308_s23, 4  ;;  %s319_s1 = int_to_ptr.vmem [resolvable:$true] %s318_s1 }
  0x40   : > { %s316_s0 = sshll.u32 %s315_s6, 4  ;;  %s1550_s26 = smov 8   ;;  %s317_s0 = int_to_ptr.hbm [resolvable:$true] %s316_s0 }
  0x41   : > { %s1551_s18 = smov 128   ;;  %336 = sbr.rel (%p1267_p7) target bundleno = 423 (0x1a7), region = 40 }
  0x42   : > { %790 = dma.hbm_to_vmem [thread:$0]  (!%p1253_p4), %s317_s0, 2048, %s319_s1, %s305_s7, %s1551_s18, %s1551_s18, %s1550_s26  }
  0x43   : > { %s1370_s15 = sand.u32 (!%p1267_p7), 1, %s1119_s22  }
  0x44   : > { %s757_s21 = sshll.u32 (!%p1267_p7), %s1370_s15, 3  ;;  %s339_s29 = scalar_lea.sflag (!%p1267_p7), [#allocation4], %s1370_s15 }
  0x45   : > { %s1376_s24 = scalar_lea.vmem (!%p1267_p7), [#allocation3], %s757_s21 }
  0x46   : > { %1086 = dma.done.wait (%p1303_p1), %s339_s29, 128  }
  0x47   : > { %1088 = vsyncadd (%p1303_p1), %s339_s29, 4294967168  ;;  %s348_s0 = sand.u32 1, %s1272_s9   ;;  %s1384_s30 = sand.u32 1, %s1107_s19  }
  0x48   : > { %s758_s14 = sshll.u32 %s1384_s30, 7  ;;  %s349_s8 = scalar_lea.sflag [#allocation7], %s348_s0 }
  0x49   : > { %s1387_s11 = scalar_lea.vmem [#allocation6], %s758_s14 }
  0x4a   : > { %1090 = dma.done.wait (%p1312_p8), %s349_s8, 2064  }
  0x4b   : > { %1092 = vsyncadd (%p1312_p8), %s349_s8, 4294965232  ;;  %s361_s17 = scalar_lea.vmem [#allocation8], %s1384_s30  ;;  %s368_s12 = scalar_lea.sflag [#allocation10], %s1384_s30 }
  0x4c   : > { %s1395_s16 = scalar_lea.vmem [#allocation9], %s758_s14 }
  0x4d   : > { %1094 = dma.done.wait (%p1312_p8), %s368_s12, 2048  }
  0x4e   : > { %1096 = vsyncadd (%p1312_p8), %s368_s12, 4294965248  ;;  %v445_v0 = vld [vmem:[%s1387_s11 + $0x78] sm:$0xff]  ;;  %v444_v1 = vld [vmem:[%s1387_s11 + $0x70] sm:$0xff]  ;;  %p417_p4 = scmp.lt.s32.totalorder %s1131_s25, 1  ;;  %s1552_s20 = sld [smem:[#allocation28_spill]] }
  0x4f   : > { %466 = vmatpush.msra.mxu0 %v445_v0  ;;  %v443_v2 = vld [vmem:[%s1387_s11 + $0x68] sm:$0xff]  ;;  %v442_v3 = vld [vmem:[%s1387_s11 + $0x60] sm:$0xff]  ;;  %v441_v4 = vld [vmem:[%s1387_s11 + $0x58] sm:$0xff]  ;;  %s1554_s23 = sld [smem:[#allocation19_spill]] }
  0x50   : > { %v440_v5 = vld [vmem:[%s1387_s11 + $0x50] sm:$0xff]  ;;  %v439_v6 = vld [vmem:[%s1387_s11 + $0x48] sm:$0xff]  ;;  %v438_v7 = vld [vmem:[%s1387_s11 + $0x40] sm:$0xff]  ;;  %s1420_s9 = scalar_select %p417_p4, %s1131_s25, 1 }
  0x51   : > { %467 = vmatpush.msra.mxu0 %v444_v1  ;;  %v437_v8 = vld [vmem:[%s1387_s11 + $0x38] sm:$0xff]  ;;  %v436_v9 = vld [vmem:[%s1387_s11 + $0x30] sm:$0xff]  ;;  %v435_v10 = vld [vmem:[%s1387_s11 + $0x28] sm:$0xff] }
  0x52   : > { %v434_v11 = vld [vmem:[%s1387_s11 + $0x20] sm:$0xff]  ;;  %v433_v12 = vld [vmem:[%s1387_s11 + $0x18] sm:$0xff]  ;;  %v432_v13 = vld [vmem:[%s1387_s11 + $0x10] sm:$0xff] }
  0x53   : > { %468 = vmatpush.msra.mxu0 %v443_v2  ;;  %v431_v14 = vld [vmem:[%s1387_s11 + $0x8] sm:$0xff]  ;;  %v430_v15 = vld [vmem:[%s1387_s11] sm:$0xff]  ;;  %v429_v16 = vld [vmem:[%s1376_s24] sm:$0xff]  ;;  %s1555_s24 = sld [smem:[#allocation29_spill]]  ;;  %s415_s11 = scalar_lea.vmem [#allocation11], %s757_s21 }
  0x54   : > { %s419_s6 = scalar_lea.vmem %s1552_s20, %s1420_s9  ;;  %v461_v17 = vld [vmem:[%s1395_s16 + $0x78] sm:$0xff]  ;;  %v460_v18 = vld [vmem:[%s1395_s16 + $0x70] sm:$0xff]  ;;  %v459_v19 = vld [vmem:[%s1395_s16 + $0x68] sm:$0xff] }
  0x55   : > { %469 = vmatpush.msra.mxu0 %v442_v3  ;;  %527 = vmatpush.msra.mxu1 %v461_v17  ;;  %v458_v20 = vld [vmem:[%s1395_s16 + $0x60] sm:$0xff]  ;;  %v457_v21 = vld [vmem:[%s1395_s16 + $0x58] sm:$0xff]  ;;  %v887_v22 = vld [vmem:[%s361_s17] ss:$0 sm:$0xff]  ;;  %s762_s1 = sshll.u32 %s1554_s23, 1  ;;  %s570_s17 = sshll.u32 %s415_s11, 4  ;;  %s571_s17 = int_to_ptr.vmem [resolvable:$true] %s570_s17 }
  0x56   : > { %v456_v23 = vld [vmem:[%s1395_s16 + $0x50] sm:$0xff]  ;;  %v455_v25 = vld [vmem:[%s1395_s16 + $0x48] sm:$0xff]  ;;  %v454_v27 = vld [vmem:[%s1395_s16 + $0x40] sm:$0xff]  ;;  %s566_s7 = sadd.s32 %s1131_s25, %s762_s1  ;;  %s555_s25 = scalar_lea.sflag [#allocation5], %s1370_s15 }
  0x57   : > { %470 = vmatpush.msra.mxu0 %v441_v4  ;;  %528 = vmatpush.msra.mxu1 %v460_v18  ;;  %v453_v29 = vld [vmem:[%s1395_s16 + $0x38] sm:$0xff]  ;;  %v452_v31 = vld [vmem:[%s1395_s16 + $0x30] sm:$0xff]  ;;  %v451_v33 = vld [vmem:[%s1395_s16 + $0x28] sm:$0xff]  ;;  %s763_s26 = sshll.u32 %s566_s7, 3 }
  0x58   : > { %v450_v35 = vld [vmem:[%s1395_s16 + $0x20] sm:$0xff]  ;;  %v449_v36 = vld [vmem:[%s1395_s16 + $0x18] sm:$0xff]  ;;  %v448_v37 = vld [vmem:[%s1395_s16 + $0x10] sm:$0xff] }
  0x59   : > { %471 = vmatpush.msra.mxu0 %v440_v5  ;;  %529 = vmatpush.msra.mxu1 %v459_v19  ;;  %v447_v38 = vld [vmem:[%s1395_s16 + $0x8] sm:$0xff]  ;;  %v446_v41 = vld [vmem:[%s1395_s16] sm:$0xff]  ;;  %s1556_s0 = smov %s1555_s24  ;;  %s568_s30 = scalar_lea.hbm %s1555_s24, %s763_s26 }
  0x5a   : > { %s572_s12 = sshll.u32 %s568_s30, 4  ;;  %s1033_s20 = scalar_lea.hbm %s1556_s0, 32  ;;  %s573_s12 = int_to_ptr.hbm [resolvable:$true] %s572_s12 }
  0x5b   : > { %472 = vmatpush.msra.mxu0 %v439_v6  ;;  %530 = vmatpush.msra.mxu1 %v458_v20  ;;  %v888_v6 = vld [vmem:[%s419_s6] ss:$0 sm:$0xff]  ;;  %s1027_s16 = sshra.s32 %s573_s12, 4  ;;  %s1028_s16 = int_to_ptr.hbm [resolvable:$true] %s1027_s16 }
  0x5c   : > { %s1029_s10 = scalar_lea.hbm %s1028_s16, 8  ;;  %p1034_p1 = scmp.lt.s32.totalorder %s1028_s16, %s1556_s0 }
  0x5d   : > { %473 = vmatpush.msra.mxu0 %v438_v7  ;;  %531 = vmatpush.msra.mxu1 %v457_v21  ;;  %p1030_p7 = scmp.ne.s32.totalorder %s1028_s16, %s1029_s10  ;;  %p1035_p0 = scmp.lt.s32.totalorder %s1033_s20, %s1029_s10 }
  0x5f   : > { %474 = vmatpush.msra.mxu0 %v437_v8  ;;  %532 = vmatpush.msra.mxu1 %v456_v23  ;;  %p1031_p10 = pnand %p1030_p7, %p1325_p11  ;;  %p1036_p3 = por %p1035_p0, %p1034_p1 }
  0x61   : > { %475 = vmatpush.msra.mxu0 %v436_v9  ;;  %533 = vmatpush.msra.mxu1 %v455_v25  ;;  %p1032_p12 = pneg %p1031_p10 }
  0x63   : > { %476 = vmatpush.msra.mxu0 %v435_v10  ;;  %534 = vmatpush.msra.mxu1 %v454_v27  ;;  %p1037_p5 = pnand %p1036_p3, %p1032_p12 }
  0x65   : > { %477 = vmatpush.msra.mxu0 %v434_v11  ;;  %535 = vmatpush.msra.mxu1 %v453_v29 }
  0x67   : > { %478 = vmatpush.msra.mxu0 %v433_v12  ;;  %536 = vmatpush.msra.mxu1 %v452_v31 }
  0x69   : > { %479 = vmatpush.msra.mxu0 %v432_v13  ;;  %537 = vmatpush.msra.mxu1 %v451_v33 }
  0x6b   : > { %480 = vmatpush.msra.mxu0 %v431_v14  ;;  %538 = vmatpush.msra.mxu1 %v450_v35 }
  0x6d   : > { %481 = vmatpush.msra.mxu0 %v430_v15  ;;  %539 = vmatpush.msra.mxu1 %v449_v36 }
  0x6e   : > { %482 = vmatmul.f32.vlgmr.msra.gmra.mxu0 %v429_v16 }
  0x6f   : > { %540 = vmatpush.msra.mxu1 %v448_v37 }
  0x71   : > { %541 = vmatpush.msra.mxu1 %v447_v38 }
  0x73   : > { %542 = vmatpush.msra.mxu1 %v446_v41 }
  0xeb   : > { %v483_v24 = vpop.f32.mrf.mxu0 }
  0xec   : > { %v484_v26 = vadd.f32 %v887_v22, %v483_v24 }
  0xee   : > { %v487_v28 = vmul.f32 0.70710677, %v484_v26  ;;  %v486_v3 = vmul.f32 0.5, %v484_v26 }
  0xf0   : > { %v488_v30 = vand.u32 2147483647, %v487_v28  ;;  %vm521_vm4 = vcmp.lt.f32.partialorder %v487_v28, 0.0 }
  0xf2   : > { %v489_v32 = vmul.f32 0.3275911, %v488_v30  ;;  %v515_v49 = vmul.f32 %v488_v30, %v488_v30 }
  0xf4   : > { %v490_v34 = vadd.f32 1.0, %v489_v32  ;;  %v516_v53 = vsub.f32 0.0, %v515_v49 }
  0xf6   : > { %889 = vrcp.f32 %v490_v34  ;;  %v502_v43 = vand.u32 2147483648, %v490_v34  ;;  %v500_v45 = vand.u32 2147483647, %v490_v34  ;;  %vm496_vm1 = vweird.f32 %v490_v34 }
  0xf7   : > { %v517_v56 = vmul.f32 1.442695, %v516_v53 }
  0xf8   : > { %v503_v47 = vor.u32 1.1754944e-38, %v502_v43  ;;  %vm501_vm3 = vcmp.eq.f32.partialorder %v500_v45, 8.507059e+37 }
  0xf9   : > { %891 = vpow2.f32 %v517_v56 }
  0xfc   : > { %v890_v39 = vpop.eup %889 }
  0xfd   : > { %v492_v40 = vmul.f32 %v890_v39, %v490_v34  ;;  %vm497_vm0 = vweird.f32 %v890_v39 }
  0xfe   : > { %vm498_vm2 = vmor %vm496_vm1, %vm497_vm0 }
  0xff   : > { %v493_v42 = vsub.f32 1.0, %v492_v40  ;;  %v892_v62 = vpop.eup %891 }
 0x101   : > { %v494_v44 = vmul.f32 %v890_v39, %v493_v42 }
 0x103   : > { %v495_v46 = vadd.f32 %v890_v39, %v494_v44 }
 0x105   : > { %v499_v48 = vsel %vm498_vm2, %v890_v39, %v495_v46 }
 0x106   : > { %v504_v50 = vsel %vm501_vm3, %v503_v47, %v499_v48 }
 0x107   : > { %v506_v51 = vmul.f32 1.0614054, %v504_v50 }
 0x109   : > { %v507_v52 = vadd.f32 -1.4531521, %v506_v51 }
 0x10b   : > { %v508_v54 = vmul.f32 %v507_v52, %v504_v50 }
 0x10d   : > { %v509_v55 = vadd.f32 1.4214138, %v508_v54 }
 0x10f   : > { %v510_v57 = vmul.f32 %v509_v55, %v504_v50 }
 0x111   : > { %v511_v58 = vadd.f32 -0.28449672, %v510_v57 }
 0x113   : > { %v512_v59 = vmul.f32 %v511_v58, %v504_v50 }
 0x115   : > { %v513_v60 = vadd.f32 0.2548296, %v512_v59 }
 0x117   : > { %v514_v61 = vmul.f32 %v513_v60, %v504_v50 }
 0x119   : > { %v519_v63 = vmul.f32 %v892_v62, %v514_v61 }
 0x11b   : > { %v520_v0 = vsub.f32 1.0, %v519_v63 }
 0x11d   : > { %v522_v1 = vsub.f32 0.0, %v520_v0 }
 0x11f   : > { %v523_v2 = vsel %vm521_vm4, %v522_v1, %v520_v0 }
 0x120   : > { %v524_v4 = vadd.f32 1.0, %v523_v2 }
 0x122   : > { %v525_v5 = vmul.f32 %v524_v4, %v486_v3 }
 0x124   : > { %543 = vmatmul.f32.vlgmr.msra.gmra.mxu1 %v525_v5 }
 0x1a1   : > { %v544_v7 = vpop.f32.mrf.mxu1 }
 0x1a2   : > { %v547_v8 = vadd.f32 %v888_v6, %v544_v7 }
 0x1a4   : > { %553 = vst [vmem:[%s415_s11] sm:$0xff] %v547_v8 }
 0x1a5   : > { %1040 = shalt.err (!%p1037_p5)
}
 0x1a6   : > { %776 = dma.vmem_to_hbm [thread:$0]  (%p1325_p11), %s571_s17, 128, %s573_s12, %s555_s25  }
 0x1a7 PF: > { %s1557_s15 = sld [smem:[#allocation17_spill]]  ;;  %p796_p6 = scmp.ge.s32.totalorder %s1143_s28, 2 }
 0x1a9   : > { %p792_p8 = pnand %p796_p6, %p1334_p13 }
 0x1ab   : > { %p793_p2 = pneg %p792_p8 }
 0x1ad   : > { %s584_s1 = sand.u32 1, %s1557_s15  }
 0x1ae   : > { %s585_s7 = scalar_lea.sflag [#allocation5], %s584_s1 }
 0x1af   : > { %1098 = dma.done.wait (%p793_p2), %s585_s7, 128  }
 0x1b0   : > { %1100 = vsyncadd (%p793_p2), %s585_s7, 4294967168  ;;  %s27_s28 = sadd.s32 1, %s1143_s28   ;;  %s1559_s26 = sld [smem:[#allocation16_spill]] }
 0x1b1   : > { %p24_p9 = scmp.ge.s32.totalorder %s27_s28, 6   ;;  %s1560_s20 = sld [smem:[#allocation23_spill]] }
 0x1b2   : > { %s1561_s4 = sld [smem:[#allocation18_spill]]  ;;  %s1566_s18 = smov %s1107_s19 }
 0x1b3   : > { %s1562_s23 = sld [smem:[#allocation24_spill]]  ;;  %s1568_s21 = smov %s1119_s22 }
 0x1b4   : > { %s1563_s24 = sld [smem:[#allocation20_spill]]  ;;  %s1570_s25 = smov %s1139_s27 }
 0x1b5   : > { %s1564_s29 = sld [smem:[#allocation21_spill]] }
 0x1b6   : > { %s1565_s30 = sld [smem:[#allocation22_spill]]  ;;  %s1567_s19 = smov %s1559_s26 }
 0x1b8   : > { %s1569_s22 = smov %s1561_s4  ;;  %26 = sbr.rel (!%p24_p9) target bundleno = 18 (0x12), region = 133 }
 0x1bb   : > { %s1571_s26 = smov %s1564_s29 }
 0x1bc   : > { %s1572_s27 = smov %s1565_s30 }
 0x1bd   :  { %591 = vsyncpa [#allocation4], 1 }
 0x1be   :  { %593 = vsyncpa [#allocation4 + $0x1], 1 }
 0x1bf   :  { %594 = vsyncpa [#allocation7], 1 }
 0x1c0   :  { %596 = vsyncpa [#allocation7 + $0x1], 1 }
 0x1c1   :  { %597 = vsyncpa [#allocation10], 1 }
 0x1c2   :  { %599 = vsyncpa [#allocation10 + $0x1], 1 }
 0x1c3   :  { %600 = vsyncpa [#allocation5], 1 }
 0x1c4   :  { %602 = vsyncpa [#allocation5 + $0x1], 1 }

</bundles_post_ra>
